<compile_context>
chip_gen: v7x
topology: tpu7x:2x2x1
jax: 0.10.0
libtpu: 0.0.40
codegen_flags: <defaults>
</compile_context>

<pallas_src>
import functools

import jax
import jax.numpy as jnp
from jax import lax
from jax.experimental import pallas as pl
from jax.experimental.pallas import tpu as pltpu


def _cosine_head_kernel(labels_ref, query_ref, support_ref, scale_ref, out_ref,
                        *, n_way: int):
    # labels_ref : (T, S, 1)  int32    VMEM
    # query_ref  : (T, Q, D)  f32/bf16 VMEM
    # support_ref: (T, S, D)  f32/bf16 VMEM
    # scale_ref  : (1,)       f32      SMEM
    # out_ref    : (T, Q, W)  f32      VMEM   (compact, W == n_way)
    labels = labels_ref[...]                                 # (T, S, 1)
    q = query_ref[...]                                       # (T, Q, D)  input dtype
    s = support_ref[...]                                     # (T, S, D)  input dtype
    t_blk, n_support, _ = labels.shape

    # Lane-major one-hot: classes along the lane axis.
    class_iota = lax.broadcasted_iota(jnp.int32, (t_blk, n_support, n_way), 2)
    onehot = (class_iota == labels).astype(s.dtype)          # (T, S, W)

    # Class prototype *sums* (MXU, native operand dtype, f32 accumulation).  The
    # per-class count division of the PyTorch code is a positive per-row rescale that
    # cosine similarity is invariant to, so it is dropped (classes are balanced).
    protos = jnp.einsum("tsw,tsd->twd", onehot, s,
                        preferred_element_type=jnp.float32)              # (T, W, D)

    # Unnormalized dots (MXU).  Operands stay in the input dtype; the norms are
    # applied to the small f32 logits below.
    logits = jnp.einsum("tqd,twd->tqw", q, protos.astype(q.dtype),
                        preferred_element_type=jnp.float32)              # (T, Q, W)

    # Norms in f32 (VPU squares + EUP rsqrt).  The clamp mirrors torch's eps=1e-8 on
    # the norm product, applied per factor here (differs only for near-zero vectors).
    qf = q.astype(jnp.float32)
    inv_q = lax.rsqrt(jnp.maximum(
        jnp.sum(qf * qf, axis=-1, keepdims=True), 1e-16))                # (T, Q, 1)
    inv_p = lax.rsqrt(jnp.maximum(
        jnp.sum(protos * protos, axis=-1), 1e-16))[:, None, :]           # (T, 1, W)

    out_ref[...] = ((scale_ref[0] * inv_q) * logits * inv_p).astype(out_ref.dtype)


def _round_up(x: int, m: int) -> int:
    return ((x + m - 1) // m) * m


def _vmem_capacity_bytes() -> int:
    try:
        cap = getattr(pltpu.get_tpu_info(), "vmem_capacity_bytes", None)
        if cap:
            return int(cap)
    except Exception:
        pass
    return 64 * 1024 * 1024        # conservative default (v7x per-core VMEM)


def classification_head(query, support, support_labels, n_way, n_shot,
                        scale, enable_scale=True):
    """JAX/Pallas equivalent of ClassificationHead(base_learner='Cosine').forward."""
    tpb, n_query, d = query.shape
    _, n_support, _ = support.shape
    assert query.ndim == 3 and support.ndim == 3
    assert query.shape[0] == support.shape[0] and query.shape[2] == support.shape[2]
    assert n_support == n_way * n_shot

    eff_scale = (scale if enable_scale else jnp.ones_like(scale)).astype(jnp.float32)
    labels = support_labels.astype(jnp.int32).reshape(tpb, n_support, 1)

    # --- Itemized per-task VMEM estimate (tile-padded shapes): double-buffered
    # in/out blocks plus the in-kernel intermediates actually materialized.
    elt = jnp.dtype(query.dtype).itemsize
    sub = 16 if elt == 2 else 8                       # sublane packing of input dtype
    d_pad = _round_up(d, 128)
    w_lane = _round_up(n_way, 128)
    q_rows_in, s_rows_in = _round_up(n_query, sub), _round_up(n_support, sub)
    q_rows, s_rows = _round_up(n_query, 8), _round_up(n_support, 8)
    w_rows = _round_up(n_way, 8)
    per_task = (
        2 * q_rows_in * d_pad * elt                   # query block   (double buffered)
        + 2 * s_rows_in * d_pad * elt                 # support block (double buffered)
        + 2 * s_rows * 128 * 4                        # labels block  (last dim 1 -> 128 lanes)
        + 2 * q_rows * w_lane * 4                     # output block  (double buffered)
        + s_rows_in * w_lane * elt                    # one-hot
        + w_rows * d_pad * (4 + elt)                  # protos f32 + operand-dtype copy
        + q_rows * (w_lane + d_pad) * 4               # logits + f32 query copy for norms
    )
    per_task = int(per_task * 1.25) + 1               # layout / spill slack

    vmem_cap = _vmem_capacity_bytes()
    vmem_limit = min(int(vmem_cap * 0.6), 96 * 1024 * 1024)   # ~38 MiB v7x, ~76 MiB v5e/v6e
    vmem_limit = max(vmem_limit, min(2 * per_task, int(vmem_cap * 0.9)))
    budget = int(vmem_limit * 0.75)

    t_blk = max(1, budget // per_task)
    if tpb >= 4:
        t_blk = min(t_blk, pl.cdiv(tpb, 4))   # >= 2 grid steps per core (v7x has 2 TCs)
    elif tpb >= 2:
        t_blk = min(t_blk, pl.cdiv(tpb, 2))
    t_blk = max(1, min(t_blk, tpb))
    n_blocks = pl.cdiv(tpb, t_blk)            # no input padding; Pallas masks the tail block

    flops = 2 * tpb * d * n_way * (n_support + n_query)
    bytes_accessed = (elt * tpb * d * (n_query + n_support)
                      + 4 * tpb * n_support
                      + 4 * tpb * n_query * n_way)

    kernel = functools.partial(_cosine_head_kernel, n_way=n_way)
    out = pl.pallas_call(
        kernel,
        out_shape=jax.ShapeDtypeStruct((tpb, n_query, n_way), jnp.float32),
        grid=(n_blocks,),
        in_specs=[
            pl.BlockSpec((t_blk, n_support, 1), lambda t: (t, 0, 0)),
            pl.BlockSpec((t_blk, n_query, d), lambda t: (t, 0, 0)),
            pl.BlockSpec((t_blk, n_support, d), lambda t: (t, 0, 0)),
            pl.BlockSpec(memory_space=pltpu.MemorySpace.SMEM),
        ],
        out_specs=pl.BlockSpec((t_blk, n_query, n_way), lambda t: (t, 0, 0)),
        compiler_params=pltpu.CompilerParams(
            dimension_semantics=("parallel",),
            vmem_limit_bytes=vmem_limit),
        cost_estimate=pl.CostEstimate(
            flops=flops,
            transcendentals=tpb * (n_query + n_way),
            bytes_accessed=bytes_accessed),
    )(labels, query, support, eff_scale)

    return out


def _reference(query, support, support_labels, n_way, scale):
    # Pure-JAX reference mirroring the PyTorch code (keeps the /counts division and
    # torch.cosine_similarity eps=1e-8 semantics).
    onehot = jax.nn.one_hot(support_labels, n_way, dtype=jnp.float32)   # (T, S, W)
    lt = jnp.swapaxes(onehot, 1, 2)                                     # (T, W, S)
    protos = jnp.einsum("tws,tsd->twd", lt, support)
    protos = protos / jnp.sum(lt, axis=2, keepdims=True)
    dots = jnp.einsum("tqd,twd->tqw", query, protos)
    qn = jnp.linalg.norm(query, axis=-1)[:, :, None]
    pn = jnp.linalg.norm(protos, axis=-1)[:, None, :]
    return scale[0] * dots / jnp.maximum(qn * pn, 1e-8)


if __name__ == "__main__":
    key = jax.random.PRNGKey(0)
    tasks_per_batch, n_way, n_shot, n_query, d = 8, 4, 2, 6, 32
    n_support = n_way * n_shot

    k1, k2, k3 = jax.random.split(key, 3)
    query = jax.random.normal(k1, (tasks_per_batch, n_query, d), dtype=jnp.float32)
    support = jax.random.normal(k2, (tasks_per_batch, n_support, d), dtype=jnp.float32)
    # n_shot examples per class, shuffled per task
    base_labels = jnp.tile(jnp.arange(n_way, dtype=jnp.int32), n_shot)
    support_labels = jnp.stack(
        [jax.random.permutation(jax.random.fold_in(k3, t), base_labels)
         for t in range(tasks_per_batch)], axis=0)

    # nn.Parameter(torch.FloatTensor([1.0])) -> deterministic init
    scale = jnp.array([1.0], dtype=jnp.float32)

    out = classification_head(query, support, support_labels, n_way, n_shot,
                              scale, enable_scale=True)
    out = jax.block_until_ready(out)

    ref = _reference(query, support, support_labels, n_way, scale)
    assert out.shape == (tasks_per_batch, n_query, n_way)
    assert jnp.allclose(out, ref, atol=1e-5, rtol=1e-5), "mismatch vs reference"

    print("KERNEL_OK")
</pallas_src>

<mosaic_0001>
module attributes {stable_mosaic.version = 11 : i64} {
  func.func @_cosine_head_kernel(%arg0: i32, %arg1: memref<2x8x1xi32, #tpu.memory_space<vmem>>, %arg2: memref<2x6x32xf32, #tpu.memory_space<vmem>>, %arg3: memref<2x8x32xf32, #tpu.memory_space<vmem>>, %arg4: memref<1xf32, #tpu.memory_space<smem>>, %arg5: memref<2x6x4xf32, #tpu.memory_space<vmem>>) attributes {dimension_semantics = [#tpu.dimension_semantics<parallel>], iteration_bounds = array<i64: 4>, scalar_prefetch = 0 : i64, scratch_operands = 0 : i64, tpu.core_type = #tpu.core_type<tc>, window_params = [{transform_indices = @transform_0, window_bounds = array<i64: 2, 8, 1>}, {transform_indices = @transform_1, window_bounds = array<i64: 2, 6, 32>}, {transform_indices = @transform_2, window_bounds = array<i64: 2, 8, 32>}, {transform_indices = @transform_3, window_bounds = array<i64: 1>}, {transform_indices = @transform_4, window_bounds = array<i64: 2, 6, 4>}]} {
    %c0 = arith.constant 0 : index
    %c0_0 = arith.constant 0 : index
    %c0_1 = arith.constant 0 : index
    %0 = vector.load %arg1[%c0, %c0_0, %c0_1] : memref<2x8x1xi32, #tpu.memory_space<vmem>>, vector<2x8x1xi32>
    %c0_2 = arith.constant 0 : index
    %c0_3 = arith.constant 0 : index
    %c0_4 = arith.constant 0 : index
    %1 = vector.load %arg2[%c0_2, %c0_3, %c0_4] : memref<2x6x32xf32, #tpu.memory_space<vmem>>, vector<2x6x32xf32>
    %c0_5 = arith.constant 0 : index
    %c0_6 = arith.constant 0 : index
    %c0_7 = arith.constant 0 : index
    %2 = vector.load %arg3[%c0_5, %c0_6, %c0_7] : memref<2x8x32xf32, #tpu.memory_space<vmem>>, vector<2x8x32xf32>
    %3 = tpu.iota {dimensions = array<i32: 2>} : vector<2x8x4xi32>
    %4 = vector.broadcast %0 : vector<2x8x1xi32> to vector<2x8x4xi32>
    %5 = arith.cmpi eq, %3, %4 : vector<2x8x4xi32>
    %6 = arith.extui %5 : vector<2x8x4xi1> to vector<2x8x4xi32>
    %7 = arith.sitofp %6 : vector<2x8x4xi32> to vector<2x8x4xf32>
    "tpu.trace_start"() <{level = 10 : i32, message = "tsw,tsd->twd"}> : () -> ()
    %cst = arith.constant dense<0.000000e+00> : vector<2x4x32xf32>
    %8 = tpu.matmul %7, %2, %cst {dimension_numbers = #tpu.dot_dimension_numbers<[1], [1], [2], [2], [0, 0, 0, 2, 1, 2], [0], [0]>} : vector<2x8x4xf32>, vector<2x8x32xf32>, vector<2x4x32xf32> -> vector<2x4x32xf32>
    "tpu.trace_stop"() : () -> ()
    "tpu.trace_start"() <{level = 10 : i32, message = "tqd,twd->tqw"}> : () -> ()
    %cst_8 = arith.constant dense<0.000000e+00> : vector<2x6x4xf32>
    %9 = tpu.matmul %1, %8, %cst_8 {dimension_numbers = #tpu.dot_dimension_numbers<[2], [2], [1], [1], [0, 0, 0, 1, 1, 1], [0], [0]>} : vector<2x6x32xf32>, vector<2x4x32xf32>, vector<2x6x4xf32> -> vector<2x6x4xf32>
    "tpu.trace_stop"() : () -> ()
    %10 = arith.mulf %1, %1 : vector<2x6x32xf32>
    %cst_9 = arith.constant dense<0.000000e+00> : vector<2x6xf32>
    %11 = vector.multi_reduction <add>, %10, %cst_9 [2] : vector<2x6x32xf32> to vector<2x6xf32>
    %12 = vector.shape_cast %11 : vector<2x6xf32> to vector<2x6x1xf32>
    %cst_10 = arith.constant 1.000000e-16 : f32
    %13 = vector.broadcast %cst_10 : f32 to vector<2x6x1xf32>
    %14 = arith.maximumf %12, %13 : vector<2x6x1xf32>
    %15 = math.rsqrt %14 : vector<2x6x1xf32>
    %16 = arith.mulf %8, %8 : vector<2x4x32xf32>
    %cst_11 = arith.constant dense<0.000000e+00> : vector<2x4xf32>
    %17 = vector.multi_reduction <add>, %16, %cst_11 [2] : vector<2x4x32xf32> to vector<2x4xf32>
    %cst_12 = arith.constant 1.000000e-16 : f32
    %18 = vector.broadcast %cst_12 : f32 to vector<2x4xf32>
    %19 = arith.maximumf %17, %18 : vector<2x4xf32>
    %20 = math.rsqrt %19 : vector<2x4xf32>
    %21 = vector.shape_cast %20 : vector<2x4xf32> to vector<2x1x4xf32>
    %c0_13 = arith.constant 0 : index
    %22 = memref.load %arg4[%c0_13] : memref<1xf32, #tpu.memory_space<smem>>
    %23 = vector.broadcast %22 : f32 to vector<2x6x1xf32>
    %24 = arith.mulf %23, %15 : vector<2x6x1xf32>
    %25 = vector.broadcast %24 : vector<2x6x1xf32> to vector<2x6x4xf32>
    %26 = arith.mulf %25, %9 : vector<2x6x4xf32>
    %27 = vector.broadcast %21 : vector<2x1x4xf32> to vector<2x6x4xf32>
    %28 = arith.mulf %26, %27 : vector<2x6x4xf32>
    %c0_14 = arith.constant 0 : index
    %c0_15 = arith.constant 0 : index
    %c0_16 = arith.constant 0 : index
    %29 = vector.load %arg5[%c0_14, %c0_15, %c0_16] : memref<2x6x4xf32, #tpu.memory_space<vmem>>, vector<2x6x4xf32>
    tpu.vector_store %arg5[%c0_14, %c0_15, %c0_16], %28 {strides = array<i32>} : memref<2x6x4xf32, #tpu.memory_space<vmem>>, vector<2x6x4xf32>,
    return
  }
  func.func @transform_0(%arg0: i32) -> (i32, i32, i32) {
    %c0_i32 = arith.constant 0 : i32
    %c0_i32_0 = arith.constant 0 : i32
    %c0_i32_1 = arith.constant 0 : i32
    return %arg0, %c0_i32, %c0_i32_0 : i32, i32, i32
  }
  func.func @transform_1(%arg0: i32) -> (i32, i32, i32) {
    %c0_i32 = arith.constant 0 : i32
    %c0_i32_0 = arith.constant 0 : i32
    %c0_i32_1 = arith.constant 0 : i32
    return %arg0, %c0_i32, %c0_i32_0 : i32, i32, i32
  }
  func.func @transform_2(%arg0: i32) -> (i32, i32, i32) {
    %c0_i32 = arith.constant 0 : i32
    %c0_i32_0 = arith.constant 0 : i32
    %c0_i32_1 = arith.constant 0 : i32
    return %arg0, %c0_i32, %c0_i32_0 : i32, i32, i32
  }
  func.func @transform_3(%arg0: i32) -> i32 {
    %c0_i32 = arith.constant 0 : i32
    %c0_i32_0 = arith.constant 0 : i32
    return %c0_i32 : i32
  }
  func.func @transform_4(%arg0: i32) -> (i32, i32, i32) {
    %c0_i32 = arith.constant 0 : i32
    %c0_i32_0 = arith.constant 0 : i32
    %c0_i32_1 = arith.constant 0 : i32
    return %arg0, %c0_i32, %c0_i32_0 : i32, i32, i32
  }
}

</mosaic_0001>

<bundles_post_ra>
// kernel: tpu_custom_call.1
= control target key start
LH: loop header
LB: loop body
LE: loop exit
PB: predicated region body
PF: predicated region fallthrough
CT: control target
= control target key end

     0   :  { %s888_s17 = smov 0   ;;  %s928_s0 = inlined_call_operand.vmem [shape: s32[8,8,1], index: 0, kind: input, shape index: {}]   ;;  %s929_s1 = inlined_call_operand.vmem [shape: f32[8,6,32], index: 1, kind: input, shape index: {}]   ;;  %s930_s2 = inlined_call_operand.vmem [shape: f32[8,8,32], index: 2, kind: input, shape index: {}]   ;;  %s931_s3 = inlined_call_operand.<no memory space> [shape: f32[1], index: 3, kind: input, shape index: {}]   ;;  %s932_s4 = inlined_call_operand.vmem [shape: f32[8,6,4], index: 4, kind: output, shape index: {}]  }
   0x1   :  { %9 = sst [smem:[#allocation2]] %s931_s3 }
   0x2 LB: > { %s771_s18 = sadd.s32 4294967295, %s855_s17   ;;  %p775_p0 = scmp.ge.s32.totalorder %s855_s17, 1  ;;  %s855_s17 = sphi %s888_s17, %s15_s17  }
   0x3   : > { %p186_p1 = scmp.lt.s32.totalorder %s855_s17, 5 }
   0x5   : > { %p187_p2 = pnand %p775_p0, %p186_p1 }
   0x6   : > { %s776_s19 = sshll.u32 (!%p187_p2), %s771_s18, 1  ;;  %v857_v0 = vmov (!%p187_p2), 0   ;;  %v858_v3 = vmov (!%p187_p2), 0.0   ;;  %v252_v4 = vlaneseq (!%p187_p2)  ;;  %vm859_vm2 = vmmov (!%p187_p2), 0   ;;  %s656_s29 = sld [smem:[#allocation2]] (!%p187_p2) }
   0x7   : > { %190 = sbr.rel (%p187_p2) target bundleno = 718 (0x2ce), region = 36  ;;  %833 = vset.pattern.permute.xlu0 (!%p187_p2), %v857_v0  ;;  %p223_p3 = scmp.lt.s32.totalorder (!%p187_p2), %s776_s19, 7  ;;  %802 = vmatprep.subr.mxu0 (!%p187_p2), %v858_v3  ;;  %vm632_vm3 = vcmask (!%p187_p2), 259072   ;;  %vm298_vm4 = vcmask (!%p187_p2), 64512   ;;  %vm477_vm5 = vcmask (!%p187_p2), 261120   ;;  %vm645_vm6 = vcmask (!%p187_p2), 257024  }
   0x8   : > { %807 = vmatprep.subr.mxu1 (!%p187_p2), %v858_v3  ;;  %v903_v5 = vand.u32 (!%p187_p2), 127, %v252_v4  ;;  %804 = vmatprep.mubr.msk.f32.mxu0 (!%p187_p2), %vm859_vm2, %v858_v3  ;;  %v665_v38 = vshrl.u32 (!%p187_p2), %v252_v4, 7  ;;  %vm688_vm7 = vcmask (!%p187_p2), 29696  }
   0x9   : > { %809 = vmatprep.mubr.msk.f32.mxu1 (!%p187_p2), %vm859_vm2, %v858_v3 }
   0xa   : > { %v666_v44 = vsub.s32 (!%p187_p2), %v903_v5, %v665_v38 }
   0xc   : > { %v657_v41 = vstv (!%p187_p2), %s656_s29 }
   0xe   : > { %s934_s19 = smov (!%p223_p3, %s776_s19), 7 }
   0xf   : > { %s896_s3 = sshll.u32 %s934_s19, 3 }
  0x10   : > { %s226_s22 = scalar_lea.vmem %s928_s0, %s896_s3  ;;  %s238_s25 = scalar_lea.vmem %s930_s2, %s896_s3 }
  0x11   : > { %v246_v1 = vld [vmem:[%s226_s22] sm:$0xff]  ;;  %v247_v2 = vld [vmem:[%s226_s22 + $0x8] sm:$0xff]  ;;  %s232_s28 = scalar_lea.vmem %s929_s1, %s896_s3  ;;  %s244_s6 = scalar_lea.vmem %s932_s4, %s896_s3 }
  0x12   : > { %255 = vperm.xlu0 %833, %v246_v1   ;;  %v250_v11 = vld [vmem:[%s238_s25] sm:$0xff]  ;;  %v251_v12 = vld [vmem:[%s238_s25 + $0x8] sm:$0xff] }
  0x13   : > { %803 = vmatpush3.msra.mxu0 %v250_v11  ;;  %808 = vmatpush3.msra.mxu1 %v251_v12  ;;  %v249_v13 = vld [vmem:[%s232_s28 + $0x8] sm:$0x3f]  ;;  %v248_v19 = vld [vmem:[%s232_s28] sm:$0x3f] }
  0x14   : > { %812 = vmatprep.subr.mxu0 %v858_v3  ;;  %817 = vmatprep.subr.mxu1 %v858_v3  ;;  %v631_v14 = vmul.f32 %v249_v13, %v249_v13  ;;  %v630_v20 = vmul.f32 %v248_v19, %v248_v19 }
  0x16   : > { %258 = vperm.xlu0 %833, %v247_v2   ;;  %v636_v15 = vsel %vm632_vm3, %v631_v14, 0.0  ;;  %v633_v21 = vsel %vm632_vm3, %v630_v20, 0.0 }
  0x35   : > { %637 = vadd.xlane.f32.xlu0 %v636_v15 }
  0x91   : > { %v256_v6 = vpop.permute.xlu0 %255 }
  0x92   : > { %vm260_vm0 = vcmp.eq.s32.totalorder %v903_v5, %v256_v6 }
  0x93   : > { %v784_v8 = vsel %vm260_vm0, 1.0, %v858_v3 }
  0x95   : > { %v259_v7 = vpop.permute.xlu0 %258 }
  0x96   : > { %vm261_vm1 = vcmp.eq.s32.totalorder %v903_v5, %v259_v7 }
  0x97   : > { %v785_v9 = vsel %vm261_vm1, 1.0, %v858_v3 }
  0x98   : > { %v834_v10 = vpack.i.bf16 %v785_v9, %v784_v8 }
  0x9a   : > { %835 = vxpose.xlu1.b32.start.end [1/1] (short) (narrow) %v834_v10, 8 }
  0xc1   : > { %634 = vadd.xlane.f32.xlu1 %v633_v21 }
  0xc2   : > { %v638_v30 = vpop.xlane.xlu0 %637 }
  0xc3   : > { %v640_v35 = vmax.f32 %v638_v30, 1e-16 }
 0x11a   : > { %v836_v16 = vpop.trf.xlu1 }
 0x11b   : > { %v840_v17 = vunpack.i.h.bf16 %v836_v16  ;;  %v837_v18 = vunpack.i.l.bf16 %v836_v16 }
 0x11d   : > { %805 = vmatmul.mubr.msk.f32.vlgmr.msra.gmra.mrb[0].mxu0 %vm298_vm4, %v837_v18  ;;  %810 = vmatmul.mubr.msk.f32.vlgmr.msra.gmra.mrb[0].mxu1 %vm298_vm4, %v840_v17 }
 0x11e   : > { %814 = vmatprep.mubr.msk.f32.mxu0 %vm859_vm2, %v858_v3  ;;  %819 = vmatprep.mubr.msk.f32.mxu1 %vm859_vm2, %v858_v3 }
 0x14e   : > { %v635_v32 = vpop.xlane.xlu1 %634 }
 0x14f   : > { %v639_v34 = vmax.f32 %v635_v32, 1e-16 }
 0x151   : > { %841 = vrsqrt.f32 %v639_v34 }
 0x152   : > { %843 = vrsqrt.f32 %v640_v35 }
 0x15b   : > { %v842_v39 = vpop.eup %841 }
 0x15c   : > { %v844_v40 = vpop.eup %843  ;;  %v658_v43 = vmul.f32 %v842_v39, %v657_v41 }
 0x15d   : > { %v659_v46 = vmul.f32 %v844_v40, %v657_v41 }
 0x1f0   : > { %v368_v22 = vpop.f32.mrb[0].mxu0  ;;  %v473_v23 = vpop.f32.mrb[0].mxu1 }
 0x1f1   : > { %v643_v24 = vmul.f32 %v368_v22, %v368_v22  ;;  %v806_v25 = vpop.f32.mrb[1].mxu0  ;;  %v811_v26 = vpop.f32.mrb[1].mxu1  ;;  %813 = vmatpush3.xpose.msk.msra.mxu0 %vm477_vm5, %v368_v22  ;;  %818 = vmatpush3.xpose.msk.msra.mxu1 %vm477_vm5, %v473_v23  ;;  %v644_v27 = vmul.f32 %v473_v23, %v473_v23 }
 0x1f3   : > { %v646_v28 = vsel %vm645_vm6, %v643_v24, 0.0  ;;  %v649_v29 = vsel %vm645_vm6, %v644_v27, 0.0 }
 0x1f4   : > { %820 = vmatmul.mubr.msk.f32.vlgmr.msra.gmra.mrb[2].mxu1 %vm477_vm5, %v249_v13  ;;  %647 = vadd.xlane.f32.xlu0 %v646_v28 }
 0x1f5   : > { %815 = vmatmul.mubr.msk.f32.vlgmr.msra.gmra.mrb[2].mxu0 %vm477_vm5, %v248_v19 }
 0x1f8   : > { %650 = vadd.xlane.f32.xlu0 %v649_v29 }
 0x281   : > { %v648_v31 = vpop.xlane.xlu0 %647 }
 0x282   : > { %v652_v37 = vmax.f32 %v648_v31, 1e-16 }
 0x285   : > { %v651_v33 = vpop.xlane.xlu0 %650 }
 0x286   : > { %v653_v36 = vmax.f32 %v651_v33, 1e-16 }
 0x288   : > { %845 = vrsqrt.f32 %v653_v36 }
 0x289   : > { %847 = vrsqrt.f32 %v652_v37 }
 0x292   : > { %v846_v42 = vpop.eup %845 }
 0x293   : > { %v848_v45 = vpop.eup %847  ;;  %v671_v50 = vrot.slane %v846_v42, %v666_v44 }
 0x294   : > { %v667_v53 = vrot.slane %v848_v45, %v666_v44 }
 0x2c7   : > { %v626_v47 = vpop.f32.mrb[2].mxu1 }
 0x2c8   : > { %v550_v48 = vpop.f32.mrb[2].mxu0  ;;  %v661_v49 = vmul.f32 %v659_v46, %v626_v47  ;;  %v821_v51 = vpop.f32.mrb[3].mxu1 }
 0x2c9   : > { %v660_v52 = vmul.f32 %v658_v43, %v550_v48  ;;  %v816_v54 = vpop.f32.mrb[3].mxu0 }
 0x2ca   : > { %v687_v55 = vmul.f32 %v671_v50, %v661_v49 }
 0x2cb   : > { %v686_v56 = vmul.f32 %v667_v53, %v660_v52 }
 0x2cc   : > { %690 = vst.msk [vmem:[%s244_s6 + $0x8] sm:$0x3f] %vm688_vm7, %v687_v55 }
 0x2cd   : > { %689 = vst.msk [vmem:[%s244_s6] sm:$0x3f] %vm688_vm7, %v686_v56 }
 0x2ce PF: > { %s15_s17 = sadd.s32 1, %s855_s17  }
 0x2cf   : > { %p12_p4 = scmp.ge.s32.totalorder %s15_s17, 6  }
 0x2d1   :  { %14 = sbr.rel (!%p12_p4) target bundleno = 2 (0x2), region = 72 }

</bundles_post_ra>
